<compile_context>
chip_gen: v7x
topology: tpu7x:2x2x1
jax: 0.10.0
libtpu: 0.0.40
codegen_flags: <defaults>
</compile_context>

<pallas_src>
import functools

import jax
import jax.numpy as jnp
import numpy as np
from jax import lax
from jax.experimental import pallas as pl
from jax.experimental.pallas import tpu as pltpu


_LANE = 128
_SUBLANE = 8
_CE_CHUNK = 256                        # rows per cross-entropy sub-tile
_NEG_INF = -1e30                       # fill value for padded vocab columns
_GATHER_INFLIGHT = 8                   # in-flight row DMAs in the gather fallback
_SINGLE_BUFFER_TABLE_BYTES = 2 << 20   # single-buffer the resident table above this


def _round_up(x, m):
    return -(-x // m) * m


# ----------------------------------------------------------------------------
# Shared in-kernel helpers
# ----------------------------------------------------------------------------
def _onehot_logits(idx, emb, *, rows, f32_exact):
    """Gather emb[idx] as onehot(idx) @ emb on the MXU; returns f32 (rows, C_pad)."""
    num_emb = emb.shape[0]
    col = lax.broadcasted_iota(jnp.int32, (rows, num_emb), 1)
    onehot = col == idx                                     # (rows, num_emb) bool
    if f32_exact:
        # f32 table: HIGHEST reconstructs f32 operands exactly and the one-hot
        # rows are exact, so the gather is bit-exact (torch parity).
        return jnp.dot(onehot.astype(jnp.float32), emb,
                       preferred_element_type=jnp.float32,
                       precision=lax.Precision.HIGHEST)
    # Narrow tables (bf16, ...): 0/1 one-hot entries are exact in the narrow
    # dtype, accumulation is f32 -> still an exact gather, full-rate MXU, and
    # no full-table f32 cast in the kernel.
    return jnp.dot(onehot.astype(emb.dtype), emb, preferred_element_type=jnp.float32)


def _ce_partial_sum(logits_f32, tgt, block_idx, *, rows, n_valid):
    """Masked sum of per-row cross-entropy over one (rows, C_pad) block.

    Processed in _CE_CHUNK-row sub-tiles so logits/exp/one-hot temporaries stay
    small (keeps the live set near vreg capacity instead of spilling to VMEM).
    """
    c_pad = logits_f32.shape[-1]
    total = jnp.float32(0.0)
    for c0 in range(0, rows, _CE_CHUNK):
        c1 = min(c0 + _CE_CHUNK, rows)
        r = c1 - c0
        lg = logits_f32[c0:c1, :]                           # (r, C_pad) f32
        tg = tgt[c0:c1, :]                                  # (r, 1) int32
        col = lax.broadcasted_iota(jnp.int32, (r, c_pad), 1)
        m = jnp.max(lg, axis=-1, keepdims=True)
        lse = m + jnp.log(jnp.sum(jnp.exp(lg - m), axis=-1, keepdims=True))
        tgt_logit = jnp.sum(jnp.where(col == tg, lg, 0.0), axis=-1, keepdims=True)
        per_row = lse - tgt_logit                           # (r, 1)
        row_global = (block_idx * rows + c0
                      + lax.broadcasted_iota(jnp.int32, (r, 1), 0))
        per_row = jnp.where(row_global < n_valid, per_row, 0.0)
        total = total + jnp.sum(per_row)
    return total


# ----------------------------------------------------------------------------
# Resident-table kernel (one-hot MXU gather)
# ----------------------------------------------------------------------------
def _resident_kernel(*refs, rows, n_valid, f32_exact, with_logits, with_loss):
    it = iter(refs)
    idx_ref = next(it)                                      # (rows, 1) int32
    tgt_ref = next(it) if with_loss else None               # (rows, 1) int32
    emb_ref = next(it)                                      # (num_emb_pad, C_pad)
    logits_ref = next(it) if with_logits else None          # (rows, C_pad)
    psum_ref = next(it) if with_loss else None              # (1, 8, 128) f32

    i = pl.program_id(0)
    logits = _onehot_logits(idx_ref[...], emb_ref[...], rows=rows, f32_exact=f32_exact)
    if with_logits:
        logits_ref[...] = logits.astype(logits_ref.dtype)
    if with_loss:
        total = _ce_partial_sum(logits, tgt_ref[...], i, rows=rows, n_valid=n_valid)
        psum_ref[...] = jnp.broadcast_to(total, psum_ref.shape)


# ----------------------------------------------------------------------------
# HBM DMA row-gather fallback (table too large to keep resident in VMEM)
# ----------------------------------------------------------------------------
def _dma_gather_rows(idx_smem, emb_hbm, dst, sems, *, base, rows):
    """dst[r, :] <- emb_hbm[idx_smem[base + r], :] with a window of in-flight DMAs."""
    nf = min(_GATHER_INFLIGHT, rows)

    def copy(r, slot):
        row = idx_smem[base + r]
        return pltpu.make_async_copy(emb_hbm.at[pl.ds(row, 1), :],
                                     dst.at[pl.ds(r, 1), :],
                                     sems.at[slot])

    @pl.loop(0, nf)
    def _prime(r):
        copy(r, r).start()

    if rows > nf:
        @pl.loop(nf, rows)
        def _steady(r):
            slot = r % nf
            copy(r - nf, slot).wait()
            copy(r, slot).start()

    @pl.loop(rows - nf, rows)
    def _drain(r):
        copy(r, r % nf).wait()


def _gather_kernel(*refs, rows, n_valid, with_logits, with_loss):
    it = iter(refs)
    idx_smem = next(it)                                     # (N_pad,) int32 in SMEM
    tgt_ref = next(it) if with_loss else None               # (rows, 1) int32
    emb_hbm = next(it)                                      # (num_emb_pad, C_pad) in HBM
    logits_ref = next(it) if with_logits else None          # (rows, C_pad)
    psum_ref = next(it) if with_loss else None              # (1, 8, 128) f32
    gbuf = next(it)                                         # VMEM (rows, C_pad) scratch
    sems = next(it)                                         # DMA semaphores

    i = pl.program_id(0)
    _dma_gather_rows(idx_smem, emb_hbm, gbuf, sems, base=i * rows, rows=rows)
    if with_logits:
        logits_ref[...] = gbuf[...]
    if with_loss:
        total = _ce_partial_sum(gbuf[...].astype(jnp.float32), tgt_ref[...], i,
                                rows=rows, n_valid=n_valid)
        psum_ref[...] = jnp.broadcast_to(total, psum_ref.shape)


# ----------------------------------------------------------------------------
# Wrapper
# ----------------------------------------------------------------------------
def bigram_forward(idx, emb, targets=None, *, block_rows=1024, return_logits=True,
                   vmem_budget_bytes=48 << 20, force_gather=False):
    """Pallas forward pass of BigramLanguageModule.

    Returns (logits, loss):
      logits: (B*T, C) in emb.dtype (None when return_logits=False),
      loss:   float32 scalar mean cross-entropy, or None when targets is None.
    """
    if targets is None and not return_logits:
        raise ValueError("targets is None and return_logits=False: nothing to compute.")

    b_dim, t_dim = idx.shape
    num_emb, n_cls = emb.shape
    n_tok = b_dim * t_dim
    with_loss = targets is not None
    with_logits = return_logits

    # ---- Pad table: rows -> multiple of 8, columns -> multiple of 128 (lane-dense
    # stores; padded columns are -1e30 so they never perturb the CE). ------------
    num_emb_pad = _round_up(num_emb, _SUBLANE)
    c_pad = _round_up(n_cls, _LANE)
    if (num_emb_pad, c_pad) != (num_emb, n_cls):
        emb_p = jnp.full((num_emb_pad, c_pad), _NEG_INF, dtype=emb.dtype)
        emb_p = emb_p.at[:num_emb, :n_cls].set(emb)
    else:
        emb_p = emb

    emb_item = emb.dtype.itemsize
    out_item = emb_item                                     # logits stored in emb.dtype
    f32_exact = emb.dtype == jnp.float32

    # ---- Resident-table vs DMA-gather decision ---------------------------------
    table_bytes = num_emb_pad * c_pad * emb_item
    single_buffer_table = table_bytes > _SINGLE_BUFFER_TABLE_BYTES
    resident_bytes = table_bytes * (1 if single_buffer_table else 2)
    use_gather = force_gather or resident_bytes > int(0.8 * vmem_budget_bytes)

    # ---- Rows per grid step, derived from the VMEM budget -----------------------
    logit_block_bytes = 2 * c_pad * out_item if with_logits else 0
    if use_gather:
        per_row = c_pad * emb_item + logit_block_bytes + (4 * c_pad if with_loss else 0)
        fixed = 0
    else:
        onehot_item = 4 if f32_exact else emb_item
        per_row = num_emb_pad * onehot_item + 4 * c_pad + logit_block_bytes
        fixed = resident_bytes
    avail = max(vmem_budget_bytes - fixed - (2 << 20), 0)
    r_budget = max(_SUBLANE, (avail // per_row) // _SUBLANE * _SUBLANE)
    rows = min(_round_up(max(n_tok, 1), _SUBLANE),
               _round_up(block_rows, _SUBLANE),
               r_budget)
    rows = max(_SUBLANE, (rows // _SUBLANE) * _SUBLANE)

    num_blocks = -(-n_tok // rows)
    n_pad = num_blocks * rows
    pad = n_pad - n_tok

    idx_flat = idx.reshape(n_tok).astype(jnp.int32)
    if pad:
        idx_flat = jnp.pad(idx_flat, (0, pad))
    if with_loss:
        tgt_flat = targets.reshape(n_tok).astype(jnp.int32)
        if pad:
            tgt_flat = jnp.pad(tgt_flat, (0, pad))
        tgt_col = tgt_flat.reshape(n_pad, 1)

    vmem_limit = int(min(max(32 << 20, fixed + rows * per_row + (8 << 20)), 120 << 20))
    cparams = pltpu.CompilerParams(
        dimension_semantics=("parallel",),    # shards the grid across TCs on v7x
        vmem_limit_bytes=vmem_limit)

    out_shapes = []
    if with_logits:
        out_shapes.append(jax.ShapeDtypeStruct((n_pad, c_pad), emb.dtype))
    if with_loss:
        # Per-block partial CE sums in aligned (8, 128) blocks (value broadcast;
        # the wrapper reads [:, 0, 0]).  Keeping per-block outputs (instead of a
        # resident accumulator) keeps the grid 'parallel' for v7x megacore.
        out_shapes.append(jax.ShapeDtypeStruct((num_blocks, _SUBLANE, _LANE),
                                               jnp.float32))

    if not use_gather:
        def blk_rows(i):
            return (i, 0)

        def blk_const(i):
            return (0, 0)

        def blk_psum(i):
            return (i, 0, 0)

        rows_spec = pl.BlockSpec((rows, 1), blk_rows)
        if single_buffer_table:
            # Constant-index table: double-buffering it is pure VMEM waste.
            emb_spec = pl.BlockSpec((num_emb_pad, c_pad), blk_const,
                                    pipeline_mode=pl.Buffered(1))
        else:
            emb_spec = pl.BlockSpec((num_emb_pad, c_pad), blk_const)

        in_specs = [rows_spec] + ([rows_spec] if with_loss else []) + [emb_spec]
        operands = [idx_flat.reshape(n_pad, 1)]
        if with_loss:
            operands.append(tgt_col)
        operands.append(emb_p)

        out_specs = []
        if with_logits:
            out_specs.append(pl.BlockSpec((rows, c_pad), blk_rows))
        if with_loss:
            out_specs.append(pl.BlockSpec((1, _SUBLANE, _LANE), blk_psum))

        kernel = functools.partial(
            _resident_kernel, rows=rows, n_valid=n_tok, f32_exact=f32_exact,
            with_logits=with_logits, with_loss=with_loss)
        outs = pl.pallas_call(
            kernel,
            out_shape=tuple(out_shapes),
            grid=(num_blocks,),
            in_specs=in_specs,
            out_specs=tuple(out_specs),
            compiler_params=cparams,
        )(*operands)
    else:
        # Scalar-prefetch the token ids to SMEM; DMA-gather embedding rows from HBM.
        def blk_rows(i, _idx):
            return (i, 0)

        def blk_psum(i, _idx):
            return (i, 0, 0)

        rows_spec = pl.BlockSpec((rows, 1), blk_rows)
        in_specs = ([rows_spec] if with_loss else []) + [pl.BlockSpec(memory_space=pl.ANY)]
        operands = ([tgt_col] if with_loss else []) + [emb_p]

        out_specs = []
        if with_logits:
            out_specs.append(pl.BlockSpec((rows, c_pad), blk_rows))
        if with_loss:
            out_specs.append(pl.BlockSpec((1, _SUBLANE, _LANE), blk_psum))

        kernel = functools.partial(
            _gather_kernel, rows=rows, n_valid=n_tok,
            with_logits=with_logits, with_loss=with_loss)
        grid_spec = pltpu.PrefetchScalarGridSpec(
            num_scalar_prefetch=1,
            grid=(num_blocks,),
            in_specs=in_specs,
            out_specs=tuple(out_specs),
            scratch_shapes=[
                pltpu.VMEM((rows, c_pad), emb.dtype),
                pltpu.SemaphoreType.DMA((min(_GATHER_INFLIGHT, rows),)),
            ])
        outs = pl.pallas_call(
            kernel,
            out_shape=tuple(out_shapes),
            grid_spec=grid_spec,
            compiler_params=cparams,
        )(idx_flat, *operands)

    outs = list(outs) if isinstance(outs, (list, tuple)) else [outs]
    logits_out = None
    if with_logits:
        logits_out = outs.pop(0)[:n_tok, :n_cls]
    loss = None
    if with_loss:
        psums = outs.pop(0)
        loss = jnp.sum(psums[:, 0, 0]) / jnp.float32(n_tok)
    return logits_out, loss


# ----------------------------------------------------------------------------
# Pure-JAX reference matching torch semantics
# ----------------------------------------------------------------------------
def _reference_forward(idx, emb, targets=None):
    b_dim, t_dim = idx.shape
    n_cls = emb.shape[1]
    logits = emb[idx].reshape(b_dim * t_dim, n_cls)
    if targets is None:
        return logits, None
    tgt = targets.reshape(-1)
    logp = jax.nn.log_softmax(logits.astype(jnp.float32), axis=-1)
    loss = -jnp.mean(jnp.take_along_axis(logp, tgt[:, None], axis=1))
    return logits, loss


if __name__ == "__main__":
    key = jax.random.PRNGKey(0)
    k_emb, k_idx, k_tgt = jax.random.split(key, 3)

    vocab = 128
    B, T = 2, 8
    # torch.nn.Embedding default init ~ N(0, 1); deterministic stand-in.
    emb = jax.random.normal(k_emb, (vocab, vocab), dtype=jnp.float32)
    idx = jax.random.randint(k_idx, (B, T), 0, vocab, dtype=jnp.int32)
    tgt = jax.random.randint(k_tgt, (B, T), 0, vocab, dtype=jnp.int32)

    ref_logits, ref_loss = _reference_forward(idx, emb, tgt)

    # 1) Training path: resident-table MXU gather, logits + loss.
    logits, loss = bigram_forward(idx, emb, tgt)
    jax.block_until_ready(loss)
    np.testing.assert_allclose(np.asarray(logits), np.asarray(ref_logits), rtol=1e-5, atol=1e-5)
    np.testing.assert_allclose(np.asarray(loss), np.asarray(ref_loss), rtol=1e-5, atol=1e-5)

    # 2) Inference path (targets=None -> loss is None, like the torch module).
    logits_i, loss_i = bigram_forward(idx, emb, None)
    jax.block_until_ready(logits_i)
    assert loss_i is None
    np.testing.assert_allclose(np.asarray(logits_i), np.asarray(ref_logits), rtol=1e-5, atol=1e-5)

    # 3) Loss-only mode (skips the (N, V) logits HBM writeback).
    logits_n, loss_n = bigram_forward(idx, emb, tgt, return_logits=False)
    jax.block_until_ready(loss_n)
    assert logits_n is None
    np.testing.assert_allclose(np.asarray(loss_n), np.asarray(ref_loss), rtol=1e-5, atol=1e-5)

    # 4) Un-aligned N exercises the padded / masked tail rows.
    B2, T2 = 3, 5
    idx2 = jax.random.randint(k_idx, (B2, T2), 0, vocab, dtype=jnp.int32)
    tgt2 = jax.random.randint(k_tgt, (B2, T2), 0, vocab, dtype=jnp.int32)
    r_lg2, r_ls2 = _reference_forward(idx2, emb, tgt2)
    lg2, ls2 = bigram_forward(idx2, emb, tgt2)
    jax.block_until_ready(ls2)
    np.testing.assert_allclose(np.asarray(lg2), np.asarray(r_lg2), rtol=1e-5, atol=1e-5)
    np.testing.assert_allclose(np.asarray(ls2), np.asarray(r_ls2), rtol=1e-5, atol=1e-5)

    # 5) Un-aligned vocab (char-model sized) exercises lane padding of the classes.
    vocab3 = 65
    emb3 = jax.random.normal(k_emb, (vocab3, vocab3), dtype=jnp.float32)
    idx3 = jax.random.randint(k_idx, (B, T), 0, vocab3, dtype=jnp.int32)
    tgt3 = jax.random.randint(k_tgt, (B, T), 0, vocab3, dtype=jnp.int32)
    r_lg3, r_ls3 = _reference_forward(idx3, emb3, tgt3)
    lg3, ls3 = bigram_forward(idx3, emb3, tgt3)
    jax.block_until_ready(ls3)
    np.testing.assert_allclose(np.asarray(lg3), np.asarray(r_lg3), rtol=1e-5, atol=1e-5)
    np.testing.assert_allclose(np.asarray(ls3), np.asarray(r_ls3), rtol=1e-5, atol=1e-5)

    # 6) Multi-block grid with masked tail (block_rows=256 -> 3 grid steps).
    B4, T4 = 2, 300
    idx4 = jax.random.randint(k_idx, (B4, T4), 0, vocab, dtype=jnp.int32)
    tgt4 = jax.random.randint(k_tgt, (B4, T4), 0, vocab, dtype=jnp.int32)
    r_lg4, r_ls4 = _reference_forward(idx4, emb, tgt4)
    lg4, ls4 = bigram_forward(idx4, emb, tgt4, block_rows=256)
    jax.block_until_ready(ls4)
    np.testing.assert_allclose(np.asarray(lg4), np.asarray(r_lg4), rtol=1e-5, atol=1e-5)
    np.testing.assert_allclose(np.asarray(ls4), np.asarray(r_ls4), rtol=1e-5, atol=1e-5)

    # 7) bf16 table: native-dtype MXU path (no HIGHEST, no in-kernel f32 table cast).
    emb_bf = emb.astype(jnp.bfloat16)
    r_lg5, r_ls5 = _reference_forward(idx, emb_bf, tgt)
    lg5, ls5 = bigram_forward(idx, emb_bf, tgt)
    jax.block_until_ready(ls5)
    np.testing.assert_allclose(np.asarray(lg5.astype(jnp.float32)),
                               np.asarray(r_lg5.astype(jnp.float32)),
                               rtol=1e-2, atol=1e-2)
    np.testing.assert_allclose(np.asarray(ls5), np.asarray(r_ls5), rtol=1e-3, atol=1e-3)

    # 8) Forced HBM DMA-gather fallback (the path very large tables take on v7x).
    lg6, ls6 = bigram_forward(idx, emb, tgt, force_gather=True)
    jax.block_until_ready(ls6)
    np.testing.assert_allclose(np.asarray(lg6), np.asarray(ref_logits), rtol=1e-5, atol=1e-5)
    np.testing.assert_allclose(np.asarray(ls6), np.asarray(ref_loss), rtol=1e-5, atol=1e-5)

    # TODO(synk): generate() (autoregressive torch.multinomial sampling loop) is a
    # host-side decode loop and is intentionally not implemented as a kernel.
    print("KERNEL_OK")
</pallas_src>

<mosaic_0001>
module attributes {stable_mosaic.version = 11 : i64} {
  func.func @_resident_kernel(%arg0: i32, %arg1: memref<16x1xi32, #tpu.memory_space<vmem>>, %arg2: memref<16x1xi32, #tpu.memory_space<vmem>>, %arg3: memref<128x128xf32, #tpu.memory_space<vmem>>, %arg4: memref<16x128xf32, #tpu.memory_space<vmem>>, %arg5: memref<1x8x128xf32, #tpu.memory_space<vmem>>) attributes {dimension_semantics = [#tpu.dimension_semantics<parallel>], iteration_bounds = array<i64: 1>, scalar_prefetch = 0 : i64, scratch_operands = 0 : i64, tpu.core_type = #tpu.core_type<tc>, window_params = [{transform_indices = @transform_0, window_bounds = array<i64: 16, 1>}, {transform_indices = @transform_1, window_bounds = array<i64: 16, 1>}, {pipeline_mode = #tpu.pipeline_mode<synchronous>, transform_indices = @transform_2, window_bounds = array<i64: 128, 128>}, {transform_indices = @transform_3, window_bounds = array<i64: 16, 128>}, {transform_indices = @transform_4, window_bounds = array<i64: 1, 8, 128>}]} {
    %c0 = arith.constant 0 : index
    %c0_0 = arith.constant 0 : index
    %0 = vector.load %arg1[%c0, %c0_0] : memref<16x1xi32, #tpu.memory_space<vmem>>, vector<16x1xi32>
    %c0_1 = arith.constant 0 : index
    %c0_2 = arith.constant 0 : index
    %1 = vector.load %arg3[%c0_1, %c0_2] : memref<128x128xf32, #tpu.memory_space<vmem>>, vector<128x128xf32>
    %2 = tpu.iota {dimensions = array<i32: 1>} : vector<16x128xi32>
    %3 = vector.broadcast %0 : vector<16x1xi32> to vector<16x128xi32>
    %4 = arith.cmpi eq, %2, %3 : vector<16x128xi32>
    %5 = arith.extui %4 : vector<16x128xi1> to vector<16x128xi32>
    %6 = arith.sitofp %5 : vector<16x128xi32> to vector<16x128xf32>
    %cst = arith.constant dense<0.000000e+00> : vector<16x128xf32>
    %7 = tpu.matmul %6, %1, %cst {dimension_numbers = #tpu.dot_dimension_numbers<[1], [0], [0], [1], [0, 0, 1, 1], [], []>, precision = #tpu.contract_precision<fp32>} : vector<16x128xf32>, vector<128x128xf32>, vector<16x128xf32> -> vector<16x128xf32>
    %c0_3 = arith.constant 0 : index
    %c0_4 = arith.constant 0 : index
    %8 = vector.load %arg4[%c0_3, %c0_4] : memref<16x128xf32, #tpu.memory_space<vmem>>, vector<16x128xf32>
    tpu.vector_store %arg4[%c0_3, %c0_4], %7 {strides = array<i32>} : memref<16x128xf32, #tpu.memory_space<vmem>>, vector<16x128xf32>,
    %c0_5 = arith.constant 0 : index
    %c0_6 = arith.constant 0 : index
    %9 = vector.load %arg2[%c0_5, %c0_6] : memref<16x1xi32, #tpu.memory_space<vmem>>, vector<16x1xi32>
    %10 = tpu.iota {dimensions = array<i32: 1>} : vector<16x128xi32>
    %cst_7 = arith.constant dense<0xFF800000> : vector<16xf32>
    %11 = vector.multi_reduction <maximumf>, %7, %cst_7 [1] : vector<16x128xf32> to vector<16xf32>
    %12 = vector.shape_cast %11 : vector<16xf32> to vector<16x1xf32>
    %13 = vector.broadcast %12 : vector<16x1xf32> to vector<16x128xf32>
    %14 = arith.subf %7, %13 : vector<16x128xf32>
    %15 = math.exp %14 : vector<16x128xf32>
    %cst_8 = arith.constant dense<0.000000e+00> : vector<16xf32>
    %16 = vector.multi_reduction <add>, %15, %cst_8 [1] : vector<16x128xf32> to vector<16xf32>
    %17 = vector.shape_cast %16 : vector<16xf32> to vector<16x1xf32>
    %18 = math.log %17 : vector<16x1xf32>
    %19 = arith.addf %12, %18 : vector<16x1xf32>
    %20 = vector.broadcast %9 : vector<16x1xi32> to vector<16x128xi32>
    %21 = arith.cmpi eq, %10, %20 : vector<16x128xi32>
    %cst_9 = arith.constant 0.000000e+00 : f32
    %22 = vector.broadcast %cst_9 : f32 to vector<16x128xf32>
    %23 = arith.select %21, %7, %22 : vector<16x128xi1>, vector<16x128xf32>
    %cst_10 = arith.constant dense<0.000000e+00> : vector<16xf32>
    %24 = vector.multi_reduction <add>, %23, %cst_10 [1] : vector<16x128xf32> to vector<16xf32>
    %25 = vector.shape_cast %24 : vector<16xf32> to vector<16x1xf32>
    %26 = arith.subf %19, %25 : vector<16x1xf32>
    %c16_i32 = arith.constant 16 : i32
    %27 = arith.muli %arg0, %c16_i32 : i32
    %c0_i32 = arith.constant 0 : i32
    %28 = arith.addi %27, %c0_i32 : i32
    %29 = tpu.iota {dimensions = array<i32: 0>} : vector<16x1xi32>
    %30 = vector.broadcast %28 : i32 to vector<16x1xi32>
    %31 = arith.addi %30, %29 : vector<16x1xi32>
    %c16_i32_11 = arith.constant 16 : i32
    %32 = vector.broadcast %c16_i32_11 : i32 to vector<16x1xi32>
    %33 = arith.cmpi slt, %31, %32 : vector<16x1xi32>
    %cst_12 = arith.constant 0.000000e+00 : f32
    %34 = vector.broadcast %cst_12 : f32 to vector<16x1xf32>
    %35 = arith.select %33, %26, %34 : vector<16x1xi1>, vector<16x1xf32>
    %36 = vector.shape_cast %35 : vector<16x1xf32> to vector<1x16x1xf32>
    %cst_13 = arith.constant dense<0.000000e+00> : vector<1xf32>
    %37 = vector.multi_reduction <add>, %36, %cst_13 [1, 2] : vector<1x16x1xf32> to vector<1xf32>
    %38 = vector.shape_cast %37 : vector<1xf32> to vector<1x1x1xf32>
    %39 = vector.extract %38[0, 0, 0] : f32 from vector<1x1x1xf32>
    %cst_14 = arith.constant 0.000000e+00 : f32
    %40 = arith.addf %cst_14, %39 : f32
    %41 = vector.broadcast %40 : f32 to vector<1x8x128xf32>
    %c0_15 = arith.constant 0 : index
    %c0_16 = arith.constant 0 : index
    %c0_17 = arith.constant 0 : index
    %42 = vector.load %arg5[%c0_15, %c0_16, %c0_17] : memref<1x8x128xf32, #tpu.memory_space<vmem>>, vector<1x8x128xf32>
    tpu.vector_store %arg5[%c0_15, %c0_16, %c0_17], %41 {strides = array<i32>} : memref<1x8x128xf32, #tpu.memory_space<vmem>>, vector<1x8x128xf32>,
    return
  }
  func.func @transform_0(%arg0: i32) -> (i32, i32) {
    %c0_i32 = arith.constant 0 : i32
    %c0_i32_0 = arith.constant 0 : i32
    return %arg0, %c0_i32 : i32, i32
  }
  func.func @transform_1(%arg0: i32) -> (i32, i32) {
    %c0_i32 = arith.constant 0 : i32
    %c0_i32_0 = arith.constant 0 : i32
    return %arg0, %c0_i32 : i32, i32
  }
  func.func @transform_2(%arg0: i32) -> (i32, i32) {
    %c0_i32 = arith.constant 0 : i32
    %c0_i32_0 = arith.constant 0 : i32
    %c0_i32_1 = arith.constant 0 : i32
    return %c0_i32, %c0_i32_0 : i32, i32
  }
  func.func @transform_3(%arg0: i32) -> (i32, i32) {
    %c0_i32 = arith.constant 0 : i32
    %c0_i32_0 = arith.constant 0 : i32
    return %arg0, %c0_i32 : i32, i32
  }
  func.func @transform_4(%arg0: i32) -> (i32, i32, i32) {
    %c0_i32 = arith.constant 0 : i32
    %c0_i32_0 = arith.constant 0 : i32
    %c0_i32_1 = arith.constant 0 : i32
    return %arg0, %c0_i32, %c0_i32_0 : i32, i32, i32
  }
}

</mosaic_0001>

<bundles_post_ra>
// kernel: tpu_custom_call.1
= control target key start
LH: loop header
LB: loop body
LE: loop exit
PB: predicated region body
PF: predicated region fallthrough
CT: control target
= control target key end

     0   :  { %10 = vsyncpa [#allocation3], 0  ;;  %s1811_s0 = inlined_call_operand.vmem [shape: s32[16,1], index: 0, kind: input, shape index: {}]   ;;  %s1812_s1 = inlined_call_operand.vmem [shape: s32[16,1], index: 1, kind: input, shape index: {}]   ;;  %s1813_s2 = inlined_call_operand.hbm [shape: f32[128,128], index: 2, kind: input, shape index: {}]   ;;  %s1814_s3 = inlined_call_operand.hbm [shape: f32[16,128], index: 3, kind: output, shape index: {0}]   ;;  %s1815_s4 = inlined_call_operand.hbm [shape: f32[1,8,128], index: 4, kind: output, shape index: {1}]  }
   0x1   :  { %11 = vsyncpa [#allocation4], 0 }
   0x2   :  { %12 = vsyncpa [#allocation7], 0  ;;  %s1466_s15 = smov [#allocation2]   ;;  %s1394_s19 = scalar_lea.hbm %s1813_s2, 2048 }
   0x3   :  { %s22_s16 = sshll.u32 %s1466_s15, 4  ;;  %p1395_p0 = scmp.ne.s32.totalorder %s1813_s2, %s1394_s19  ;;  %s23_s16 = int_to_ptr.vmem [resolvable:$true] %s22_s16 }
   0x4   :  { %p1398_p1 = scmp.lt.u32.totalorder %s1394_s19, %s1813_s2 }
   0x6   :  { %p1400_p2 = pnand %p1398_p1, %p1395_p0 }
   0x8   :  { %1403 = shalt.err (!%p1400_p2)
}
   0x9   :  { %s1404_s24 = scalar_lea.vmem %s23_s16, 2048  ;;  %p1409_p4 = scmp.lt.s32.totalorder %s23_s16, %s23_s16 }
   0xa   :  { %p1405_p3 = scmp.ne.s32.totalorder %s23_s16, %s1404_s24  ;;  %p1410_p5 = scmp.lt.s32.totalorder %s1404_s24, %s1404_s24 }
   0xc   :  { %p1411_p6 = por %p1410_p5, %p1409_p4 }
   0xe   :  { %p1412_p7 = pnand %p1411_p6, %p1405_p3 }
  0x10   :  { %1415 = shalt.err (!%p1412_p7)
}
  0x11   :  { %s1467_s25 = smov 128   ;;  %s1468_s26 = smov 8  }
  0x12   :  { %28 = dma.hbm_to_vmem [thread:$0]  %s1813_s2, 2048, %s23_s16, [#allocation3], %s1467_s25, %s1467_s25, %s1468_s26  }
  0x13   :  { %1460 = dma.done.wait [#allocation3], 2048  }
  0x14   :  { %1461 = vsyncadd [#allocation3], 4294965248  ;;  %v1469_v0 = vmov 0   ;;  %v32_v1 = vld [vmem:[%s1811_s0] sm:$0xff]  ;;  %v33_v2 = vld [vmem:[%s1811_s0 + $0x8] sm:$0xff]  ;;  %vm799_vm4 = vcmask 7168  }
  0x15   :  { %1384 = vset.pattern.permute.xlu0 %v1469_v0  ;;  %1385 = vset.pattern.permute.xlu1 %v1469_v0  ;;  %v34_v3 = vld [vmem:[#allocation2] sm:$0xff]  ;;  %v35_v4 = vld [vmem:[#allocation2 + $0x8] sm:$0xff]  ;;  %v36_v5 = vld [vmem:[#allocation2 + $0x10] sm:$0xff] }
  0x16   :  { %53 = vperm.xlu0 %1384, %v32_v1   ;;  %v65_v6 = vand.u32 4294901760, %v34_v3  ;;  %v68_v7 = vand.u32 4294901760, %v35_v4  ;;  %v37_v8 = vld [vmem:[#allocation2 + $0x18] sm:$0xff]  ;;  %v71_v9 = vand.u32 4294901760, %v36_v5  ;;  %v38_v10 = vld [vmem:[#allocation2 + $0x20] sm:$0xff]  ;;  %v39_v11 = vld [vmem:[#allocation2 + $0x28] sm:$0xff] }
  0x17   :  { %v74_v12 = vand.u32 4294901760, %v37_v8  ;;  %v77_v14 = vand.u32 4294901760, %v38_v10  ;;  %v80_v15 = vand.u32 4294901760, %v39_v11  ;;  %v40_v17 = vld [vmem:[#allocation2 + $0x30] sm:$0xff]  ;;  %v41_v18 = vld [vmem:[#allocation2 + $0x38] sm:$0xff]  ;;  %v750_v19 = vld [vmem:[%s1812_s1] sm:$0xff] }
  0x18   :  { %v1520_v13 = vpack.c.bf16 %v68_v7, %v65_v6  ;;  %v83_v21 = vand.u32 4294901760, %v40_v17  ;;  %v86_v22 = vand.u32 4294901760, %v41_v18  ;;  %v42_v23 = vld [vmem:[#allocation2 + $0x40] sm:$0xff]  ;;  %v43_v24 = vld [vmem:[#allocation2 + $0x48] sm:$0xff]  ;;  %v1535_v25 = vsub.f32 %v36_v5, %v71_v9  ;;  %v1541_v29 = vld [vmem:[#allocation2 + $0x50] sm:$0xff] }
  0x19   :  { %v1522_v16 = vpack.c.bf16 %v74_v12, %v71_v9  ;;  %v1533_v20 = vpack.c.bf16 %v80_v15, %v77_v14  ;;  %v1537_v26 = vsub.f32 %v37_v8, %v74_v12  ;;  %v89_v27 = vand.u32 4294901760, %v42_v23  ;;  %v1549_v33 = vld [vmem:[#allocation2 + $0x58] sm:$0xff]  ;;  %v1565_v42 = vld [vmem:[#allocation2 + $0x60] sm:$0xff]  ;;  %v1569_v45 = vld [vmem:[#allocation2 + $0x68] sm:$0xff] }
  0x1a   :  { %56 = vperm.xlu0 %1384, %v33_v2   ;;  %1269 = vmatprep.subr.bf16.mxu0 %v1520_v13  ;;  %v92_v28 = vand.u32 4294901760, %v43_v24  ;;  %v182_v30 = vand.u32 4294901760, %v1535_v25  ;;  %v1547_v32 = vpack.c.bf16 %v86_v22, %v83_v21  ;;  %v95_v37 = vand.u32 4294901760, %v1541_v29  ;;  %v1593_v59 = vld [vmem:[#allocation2 + $0x70] sm:$0xff]  ;;  %v49_v62 = vld [vmem:[#allocation2 + $0x78] sm:$0xff] }
  0x1b   :  { %1173 = vmatprep.subr.bf16.mxu1 %v1520_v13  ;;  %1271 = vmatpush3.bf16.msra.mxu0 %v1520_v13  ;;  %v189_v31 = vand.u32 4294901760, %v1537_v26  ;;  %v1556_v38 = vsub.f32 %v38_v10, %v77_v14  ;;  %v1558_v39 = vsub.f32 %v39_v11, %v80_v15  ;;  %v98_v41 = vand.u32 4294901760, %v1549_v33 }
  0x1c   :  { %1175 = vmatpush3.bf16.msra.mxu1 %v1520_v13  ;;  %1273 = vmatprep.subr.bf16.mxu0 %v1522_v16  ;;  %v183_v35 = vsub.f32 %v1535_v25, %v182_v30  ;;  %v1562_v40 = vpack.c.bf16 %v92_v28, %v89_v27  ;;  %v1571_v46 = vsub.f32 %v34_v3, %v65_v6  ;;  %v101_v53 = vand.u32 4294901760, %v1565_v42 }
  0x1d   :  { %1177 = vmatprep.subr.bf16.mxu1 %v1522_v16  ;;  %v1551_v34 = vpack.c.bf16 %v189_v31, %v182_v30  ;;  %v190_v36 = vsub.f32 %v1537_v26, %v189_v31  ;;  %v1573_v47 = vsub.f32 %v35_v4, %v68_v7  ;;  %v196_v48 = vand.u32 4294901760, %v1556_v38 }
  0x1e   :  { %773 = vperm.xlu0 %1384, %v750_v19   ;;  %v184_v43 = vand.u32 4294901760, %v183_v35  ;;  %v203_v49 = vand.u32 4294901760, %v1558_v39  ;;  %v1579_v51 = vsub.f32 %v40_v17, %v83_v21  ;;  %v1581_v52 = vsub.f32 %v41_v18, %v86_v22 }
  0x1f   :  { %1275 = vmatpush3.bf16.msra.mxu0 %v1522_v16  ;;  %v191_v44 = vand.u32 4294901760, %v190_v36  ;;  %v197_v55 = vsub.f32 %v1556_v38, %v196_v48  ;;  %v1590_v57 = vpack.c.bf16 %v98_v41, %v95_v37  ;;  %v104_v58 = vand.u32 4294901760, %v1569_v45 }
  0x20   :  { %1179 = vmatpush3.bf16.msra.mxu1 %v1522_v16  ;;  %1277 = vmatprep.subr.bf16.mxu0 %v1533_v20  ;;  %v1584_v54 = vpack.c.bf16 %v203_v49, %v196_v48  ;;  %v204_v56 = vsub.f32 %v1558_v39, %v203_v49  ;;  %v210_v60 = vand.u32 4294901760, %v1579_v51  ;;  %v217_v61 = vand.u32 4294901760, %v1581_v52 }
  0x21   :  { %1181 = vmatprep.subr.bf16.mxu1 %v1533_v20  ;;  %v1577_v50 = vpack.c.bf16 %v191_v44, %v184_v43  ;;  %v168_v63 = vand.u32 4294901760, %v1571_v46  ;;  %v175_v0 = vand.u32 4294901760, %v1573_v47  ;;  %v198_v1 = vand.u32 4294901760, %v197_v55 }
  0x22   :  { %v205_v2 = vand.u32 4294901760, %v204_v56  ;;  %v1601_v3 = vpack.c.bf16 %v217_v61, %v210_v60  ;;  %v211_v4 = vsub.f32 %v1579_v51, %v210_v60  ;;  %v218_v5 = vsub.f32 %v1581_v52, %v217_v61 }
  0x23   :  { %1279 = vmatpush3.bf16.msra.mxu0 %v1533_v20  ;;  %v1605_v6 = vsub.f32 %v42_v23, %v89_v27  ;;  %v107_v7 = vand.u32 4294901760, %v1593_v59  ;;  %v1610_v9 = vsub.f32 %v43_v24, %v92_v28  ;;  %v110_v10 = vand.u32 4294901760, %v49_v62 }
  0x24   :  { %1183 = vmatpush3.bf16.msra.mxu1 %v1533_v20  ;;  %1281 = vmatprep.subr.bf16.mxu0 %v1547_v32  ;;  %v1608_v8 = vpack.c.bf16 %v205_v2, %v198_v1  ;;  %v212_v11 = vand.u32 4294901760, %v211_v4  ;;  %v219_v12 = vand.u32 4294901760, %v218_v5  ;;  %v1617_v15 = vpack.c.bf16 %v104_v58, %v101_v53 }
  0x25   :  { %1185 = vmatprep.subr.bf16.mxu1 %v1547_v32  ;;  %v224_v14 = vand.u32 4294901760, %v1605_v6  ;;  %v169_v17 = vsub.f32 %v1571_v46, %v168_v63  ;;  %v176_v18 = vsub.f32 %v1573_v47, %v175_v0  ;;  %v231_v19 = vand.u32 4294901760, %v1610_v9 }
  0x26   :  { %v1622_v21 = vpack.c.bf16 %v219_v12, %v212_v11  ;;  %v237_v23 = vsub.f32 %v1541_v29, %v95_v37  ;;  %v244_v24 = vsub.f32 %v1549_v33, %v98_v41  ;;  %v1634_v36 = vpack.c.bf16 %v110_v10, %v107_v7 }
  0x27   :  { %1283 = vmatpush3.bf16.msra.mxu0 %v1547_v32  ;;  %v225_v22 = vsub.f32 %v1605_v6, %v224_v14  ;;  %v1627_v27 = vpack.c.bf16 %v231_v19, %v224_v14  ;;  %v232_v28 = vsub.f32 %v1610_v9, %v231_v19  ;;  %v170_v29 = vand.u32 4294901760, %v169_v17 }
  0x28   :  { %1187 = vmatpush3.bf16.msra.mxu1 %v1547_v32  ;;  %1285 = vmatprep.subr.bf16.mxu0 %v1562_v40  ;;  %v238_v31 = vand.u32 4294901760, %v237_v23  ;;  %v245_v35 = vand.u32 4294901760, %v244_v24  ;;  %v177_v37 = vand.u32 4294901760, %v176_v18  ;;  %v251_v48 = vsub.f32 %v1565_v42, %v101_v53 }
  0x29   :  { %1189 = vmatprep.subr.bf16.mxu1 %v1562_v40  ;;  %v226_v30 = vand.u32 4294901760, %v225_v22  ;;  %v233_v33 = vand.u32 4294901760, %v232_v28  ;;  %v258_v55 = vsub.f32 %v1569_v45, %v104_v58  ;;  %v1300_v1 = vpack.c.bf16 %v175_v0, %v168_v63 }
  0x2a   :  { %v1636_v41 = vpack.c.bf16 %v245_v35, %v238_v31  ;;  %v239_v43 = vsub.f32 %v237_v23, %v238_v31  ;;  %v246_v44 = vsub.f32 %v244_v24, %v245_v35  ;;  %v252_v61 = vand.u32 4294901760, %v251_v48 }
  0x2b   :  { %1287 = vmatpush3.bf16.msra.mxu0 %v1562_v40  ;;  %v1639_v49 = vpack.c.bf16 %v233_v33, %v226_v30  ;;  %v1204_v2 = vpack.c.bf16 %v177_v37, %v170_v29  ;;  %v259_v4 = vand.u32 4294901760, %v258_v55  ;;  %v265_v53 = vsub.f32 %v1593_v59, %v107_v7 }
  0x2c   :  { %1191 = vmatpush3.bf16.msra.mxu1 %v1562_v40  ;;  %1289 = vmatprep.subr.bf16.mxu0 %v1590_v57  ;;  %v240_v56 = vand.u32 4294901760, %v239_v43  ;;  %v247_v60 = vand.u32 4294901760, %v246_v44  ;;  %v253_v42 = vsub.f32 %v251_v48, %v252_v61  ;;  %v272_v45 = vsub.f32 %v49_v62, %v110_v10 }
  0x2d   :  { %1193 = vmatprep.subr.bf16.mxu1 %v1590_v57  ;;  %v1649_v58 = vpack.c.bf16 %v259_v4, %v252_v61  ;;  %v260_v11 = vsub.f32 %v258_v55, %v259_v4  ;;  %v266_v14 = vand.u32 4294901760, %v265_v53  ;;  %v1659_v10 = vpack.c.bf16 %v1573_v47, %v1571_v46 }
  0x2e   :  { %v1646_v5 = vpack.c.bf16 %v247_v60, %v240_v56  ;;  %v254_v12 = vand.u32 4294901760, %v253_v42  ;;  %v273_v17 = vand.u32 4294901760, %v272_v45  ;;  %v1663_v28 = vpack.c.bf16 %v1537_v26, %v1535_v25 }
  0x2f   :  { %1291 = vmatpush3.bf16.msra.mxu0 %v1590_v57  ;;  %v261_v63 = vand.u32 4294901760, %v260_v11  ;;  %v267_v18 = vsub.f32 %v265_v53, %v266_v14  ;;  %v1667_v30 = vpack.c.bf16 %v1558_v39, %v1556_v38  ;;  %v1671_v31 = vpack.c.bf16 %v1581_v52, %v1579_v51 }
  0x30   :  { %1195 = vmatpush3.bf16.msra.mxu1 %v1590_v57  ;;  %1293 = vmatprep.subr.bf16.mxu0 %v1617_v15  ;;  %v1653_v0 = vpack.c.bf16 %v273_v17, %v266_v14  ;;  %v274_v19 = vsub.f32 %v272_v45, %v273_v17  ;;  %v1675_v35 = vpack.c.bf16 %v1610_v9, %v1605_v6  ;;  %v50_v25 = vlaneseq }
  0x31   :  { %1197 = vmatprep.subr.bf16.mxu1 %v1617_v15  ;;  %v1228_v22 = vpack.c.bf16 %v261_v63, %v254_v12  ;;  %v268_v59 = vand.u32 4294901760, %v267_v18  ;;  %v1677_v29 = vpack.c.bf16 %v244_v24, %v237_v23  ;;  %v1679_v46 = vpack.c.bf16 %v258_v55, %v251_v48 }
  0x32   :  { %v275_v62 = vand.u32 4294901760, %v274_v19  ;;  %v1681_v47 = vpack.c.bf16 %v272_v45, %v265_v53  ;;  %v1683_v26 = vand.u32 127, %v50_v25  ;;  %v1470_v38 = vmov 0.0  }
  0x33   :  { %1295 = vmatpush3.bf16.msra.mxu0 %v1617_v15  ;;  %v1471_v48 = vmov 1.0  }
  0x34   :  { %1199 = vmatpush3.bf16.msra.mxu1 %v1617_v15  ;;  %1297 = vmatprep.subr.bf16.mxu0 %v1634_v36  ;;  %v1655_v7 = vpack.c.bf16 %v275_v62, %v268_v59 }
  0x35   :  { %1201 = vmatprep.subr.bf16.mxu1 %v1634_v36 }
  0x37   :  { %1299 = vmatpush3.bf16.msra.mxu0 %v1634_v36 }
  0x38   :  { %1203 = vmatpush3.bf16.msra.mxu1 %v1634_v36  ;;  %1301 = vmatprep.subr.bf16.mxu0 %v1300_v1 }
  0x39   :  { %1205 = vmatprep.subr.bf16.mxu1 %v1204_v2 }
  0x95   :  { %v54_v37 = vpop.permute.xlu0 %53 }
  0x96   :  { %vm58_vm0 = vcmp.eq.s32.totalorder %v1683_v26, %v54_v37 }
  0x97   :  { %v846_v39 = vsel %vm58_vm0, 1.0, %v1470_v38 }
  0x98   :  { %v146_v51 = vsub.f32 %v846_v39, %v846_v39 }
  0x99   :  { %v1688_v52 = vpop.permute.xlu0 %56 }
  0x9a   :  { %vm59_vm1 = vcmp.eq.s32.totalorder %v1683_v26, %v1688_v52  ;;  %v147_v6 = vand.u32 4294901760, %v146_v51 }
  0x9b   :  { %v847_v9 = vsel %vm59_vm1, 1.0, %v1470_v38 }
  0x9c   :  { %v1695_v23 = vsub.f32 %v847_v9, %v847_v9  ;;  %1099 = vmatprep.mubr.f32.mxu0 %v147_v6  ;;  %v148_v24 = vsub.f32 %v146_v51, %v147_v6 }
  0x9e   :  { %v149_v33 = vand.u32 4294901760, %v148_v24  ;;  %v157_v43 = vand.u32 4294901760, %v1695_v23 }
  0xa0   :  { %994 = vmatprep.mubr.f32.mxu1 %v149_v33  ;;  %1100 = vmatmul.mubr.f32.vlgmr.msra.gmra.mrb[0].mxu0 %v157_v43  ;;  %v158_v44 = vsub.f32 %v1695_v23, %v157_v43 }
  0xa1   :  { %1303 = vmatpush3.bf16.msra.mxu0 %v1300_v1  ;;  %1134 = vmatprep.mubr.msk.f32.mxu0 %vm58_vm0, %v1471_v48 }
  0xa2   :  { %1305 = vmatprep.subr.bf16.mxu0 %v1551_v34  ;;  %v159_v55 = vand.u32 4294901760, %v158_v44 }
  0xa4   :  { %995 = vmatmul.mubr.f32.vlgmr.msra.gmra.mrb[0].mxu1 %v159_v55 }
  0xa5   :  { %1207 = vmatpush3.bf16.msra.mxu1 %v1204_v2  ;;  %1307 = vmatpush3.bf16.msra.mxu0 %v1551_v34 }
  0xa6   :  { %1029 = vmatprep.mubr.msk.f32.mxu1 %vm58_vm0, %v1471_v48  ;;  %1209 = vmatprep.subr.bf16.mxu1 %v1577_v50 }
  0xa7   :  { %1309 = vmatprep.subr.bf16.mxu0 %v1584_v54 }
  0xa9   :  { %1211 = vmatpush3.bf16.msra.mxu1 %v1577_v50  ;;  %1311 = vmatpush3.bf16.msra.mxu0 %v1584_v54  ;;  %v751_v50 = vld [vmem:[%s1812_s1 + $0x8] sm:$0xff]  ;;  %s1472_s1 = smov [#allocation5]  }
  0xaa   :  { %1213 = vmatprep.subr.bf16.mxu1 %v1608_v8  ;;  %1313 = vmatprep.subr.bf16.mxu0 %v1601_v3  ;;  %s820_s9 = sshll.u32 %s1472_s1, 4  ;;  %s821_s9 = int_to_ptr.vmem [resolvable:$true] %s820_s9 }
  0xab   :  { %s1416_s10 = scalar_lea.vmem %s821_s9, 256  ;;  %p1421_p9 = scmp.lt.s32.totalorder %s821_s9, %s821_s9 }
  0xac   :  { %p1417_p8 = scmp.ne.s32.totalorder %s821_s9, %s1416_s10  ;;  %p1422_p10 = scmp.lt.s32.totalorder %s1416_s10, %s1416_s10 }
  0xad   :  { %1215 = vmatpush3.bf16.msra.mxu1 %v1608_v8  ;;  %1315 = vmatpush3.bf16.msra.mxu0 %v1601_v3 }
  0xae   :  { %1217 = vmatprep.subr.bf16.mxu1 %v1622_v21  ;;  %1317 = vmatprep.subr.bf16.mxu0 %v1627_v27  ;;  %p1423_p11 = por %p1422_p10, %p1421_p9 }
  0xb0   :  { %p1424_p12 = pnand %p1423_p11, %p1417_p8 }
  0xb1   :  { %1219 = vmatpush3.bf16.msra.mxu1 %v1622_v21  ;;  %1319 = vmatpush3.bf16.msra.mxu0 %v1627_v27 }
  0xb2   :  { %1221 = vmatprep.subr.bf16.mxu1 %v1639_v49  ;;  %1321 = vmatprep.subr.bf16.mxu0 %v1636_v41 }
  0xb5   :  { %1223 = vmatpush3.bf16.msra.mxu1 %v1639_v49  ;;  %1323 = vmatpush3.bf16.msra.mxu0 %v1636_v41  ;;  %v774_v41 = vpop.permute.xlu0 %773 }
  0xb6   :  { %1225 = vmatprep.subr.bf16.mxu1 %v1646_v5  ;;  %1325 = vmatprep.subr.bf16.mxu0 %v1649_v58  ;;  %vm778_vm2 = vcmp.eq.s32.totalorder %v1683_v26, %v774_v41 }
  0xb9   :  { %1227 = vmatpush3.bf16.msra.mxu1 %v1646_v5  ;;  %1327 = vmatpush3.bf16.msra.mxu0 %v1649_v58 }
  0xba   :  { %1229 = vmatprep.subr.bf16.mxu1 %v1228_v22  ;;  %1329 = vmatprep.subr.bf16.mxu0 %v1653_v0 }
  0xbd   :  { %1231 = vmatpush3.bf16.msra.mxu1 %v1228_v22  ;;  %1331 = vmatpush3.bf16.msra.mxu0 %v1653_v0 }
  0xbe   :  { %1233 = vmatprep.subr.bf16.mxu1 %v1655_v7  ;;  %1333 = vmatprep.subr.bf16.mxu0 %v1520_v13 }
  0xc0   :  { %1135 = vmatmul.mubr.msk.f32.vlgmr.msra.gmra.mrb[0].mxu0 %vm59_vm1, %v1471_v48 }
  0xc1   :  { %1235 = vmatpush3.bf16.msra.mxu1 %v1655_v7  ;;  %1335 = vmatpush3.bf16.msra.mxu0 %v1520_v13 }
  0xc2   :  { %1169 = vmatprep.mubr.msk.f32.mxu0 %vm58_vm0, %v1471_v48  ;;  %1237 = vmatprep.subr.bf16.mxu1 %v1659_v10 }
  0xc3   :  { %1337 = vmatprep.subr.bf16.mxu0 %v1522_v16 }
  0xc4   :  { %1030 = vmatmul.mubr.msk.f32.vlgmr.msra.gmra.mrb[0].mxu1 %vm59_vm1, %v1471_v48 }
  0xc5   :  { %1239 = vmatpush3.bf16.msra.mxu1 %v1659_v10  ;;  %1064 = vmatprep.mubr.f32.mxu1 %v146_v51 }
  0xc6   :  { %1339 = vmatpush3.bf16.msra.mxu0 %v1522_v16  ;;  %1241 = vmatprep.subr.bf16.mxu1 %v1663_v28 }
  0xc7   :  { %1341 = vmatprep.subr.bf16.mxu0 %v1533_v20 }
  0xc9   :  { %1243 = vmatpush3.bf16.msra.mxu1 %v1663_v28 }
  0xca   :  { %1343 = vmatpush3.bf16.msra.mxu0 %v1533_v20  ;;  %1245 = vmatprep.subr.bf16.mxu1 %v1667_v30 }
  0xcb   :  { %1345 = vmatprep.subr.bf16.mxu0 %v1547_v32 }
  0xcd   :  { %1247 = vmatpush3.bf16.msra.mxu1 %v1667_v30 }
  0xce   :  { %1347 = vmatpush3.bf16.msra.mxu0 %v1547_v32  ;;  %1249 = vmatprep.subr.bf16.mxu1 %v1671_v31 }
  0xcf   :  { %1349 = vmatprep.subr.bf16.mxu0 %v1562_v40 }
  0xd1   :  { %1251 = vmatpush3.bf16.msra.mxu1 %v1671_v31 }
  0xd2   :  { %1351 = vmatpush3.bf16.msra.mxu0 %v1562_v40  ;;  %1253 = vmatprep.subr.bf16.mxu1 %v1675_v35 }
  0xd3   :  { %1353 = vmatprep.subr.bf16.mxu0 %v1590_v57 }
  0xd5   :  { %1255 = vmatpush3.bf16.msra.mxu1 %v1675_v35 }
  0xd6   :  { %1355 = vmatpush3.bf16.msra.mxu0 %v1590_v57  ;;  %1257 = vmatprep.subr.bf16.mxu1 %v1677_v29 }
  0xd7   :  { %1357 = vmatprep.subr.bf16.mxu0 %v1617_v15 }
  0xd9   :  { %1259 = vmatpush3.bf16.msra.mxu1 %v1677_v29 }
  0xda   :  { %1359 = vmatpush3.bf16.msra.mxu0 %v1617_v15  ;;  %1261 = vmatprep.subr.bf16.mxu1 %v1679_v46 }
  0xdb   :  { %1361 = vmatprep.subr.bf16.mxu0 %v1634_v36 }
  0xdd   :  { %1263 = vmatpush3.bf16.msra.mxu1 %v1679_v46 }
  0xde   :  { %1363 = vmatpush3.bf16.msra.mxu0 %v1634_v36  ;;  %1265 = vmatprep.subr.bf16.mxu1 %v1681_v47 }
  0xe1   :  { %1170 = vmatmul.mubr.msk.f32.vlgmr.msra.gmra.mrb[0].mxu0 %vm59_vm1, %v1471_v48  ;;  %1267 = vmatpush3.bf16.msra.mxu1 %v1681_v47 }
  0xe4   :  { %1065 = vmatmul.mubr.f32.vlgmr.msra.gmra.mrb[0].mxu1 %v1695_v23 }
 0x1b4   :  { %v1171_v13 = vpop.f32.mrb[0].mxu0 }
 0x1b5   :  { %v738_v16 = vpop.f32.mrb[1].mxu0 }
 0x1b7   :  { %v1066_v20 = vpop.f32.mrb[0].mxu1 }
 0x1b8   :  { %v1364_v32 = vadd.f32 %v1171_v13, %v1066_v20  ;;  %v422_v34 = vpop.f32.mrb[1].mxu1 }
 0x1b9   :  { %v1365_v40 = vadd.f32 %v738_v16, %v422_v34 }
 0x1ba   :  { %749 = vst [vmem:[#allocation5 + $0x8] sm:$0xff] %v1364_v32  ;;  %754 = vmax.xlane.f32.xlu1 %v1364_v32 }
 0x1bb   :  { %748 = vst [vmem:[#allocation5] sm:$0xff] %v1365_v40  ;;  %v780_v56 = vsel %vm778_vm2, %v1365_v40, 0.0 }
 0x1be   :  { %752 = vmax.xlane.f32.xlu1 %v1365_v40 }
 0x1cf   :  { %776 = vperm.xlu1 %1385, %v751_v50  }
 0x247   :  { %v755_v54 = vpop.xlane.xlu1 %754 }
 0x248   :  { %v757_v57 = vsub.f32 %v1364_v32, %v755_v54 }
 0x24a   :  { %v760_v3 = vmul.f32 1.442695, %v757_v57 }
 0x24b   :  { %v753_v8 = vpop.xlane.xlu1 %752 }
 0x24c   :  { %1386 = vpow2.f32 %v760_v3  ;;  %v756_v15 = vsub.f32 %v1365_v40, %v753_v8 }
 0x24e   :  { %v758_v21 = vmul.f32 1.442695, %v756_v15 }
 0x24f   :  { %v777_v49 = vpop.permute.xlu1 %776 }
 0x250   :  { %1388 = vpow2.f32 %v758_v21  ;;  %vm779_vm3 = vcmp.eq.s32.totalorder %v1683_v26, %v777_v49 }
 0x251   :  { %v781_v60 = vsel %vm779_vm3, %v1364_v32, 0.0 }
 0x256   :  { %v1387_v27 = vpop.eup %1386 }
 0x257   :  { %764 = vadd.xlane.f32.xlu1 %v1387_v27 }
 0x25a   :  { %v1389_v36 = vpop.eup %1388 }
 0x25b   :  { %762 = vadd.xlane.f32.xlu0 %v1389_v36 }
 0x25f   :  { %782 = vadd.xlane.f32.xlu0 %v780_v56 }
 0x263   :  { %784 = vadd.xlane.f32.xlu0 %v781_v60 }
 0x2e4   :  { %v765_v61 = vpop.xlane.xlu1 %764 }
 0x2e5   :  { %1390 = vlog2.f32 %v765_v61 }
 0x2e8   :  { %v763_v1 = vpop.xlane.xlu0 %762 }
 0x2e9   :  { %1392 = vlog2.f32 %v763_v1 }
 0x2ec   :  { %v783_v4 = vpop.xlane.xlu0 %782 }
 0x2ef   :  { %v1391_v2 = vpop.eup %1390 }
 0x2f0   :  { %v769_v5 = vmul.f32 0.6931472, %v1391_v2  ;;  %v785_v58 = vpop.xlane.xlu0 %784 }
 0x2f2   :  { %v771_v42 = vadd.f32 %v769_v5, %v755_v54 }
 0x2f3   :  { %v1393_v53 = vpop.eup %1392 }
 0x2f4   :  { %v767_v45 = vmul.f32 0.6931472, %v1393_v53  ;;  %v787_v12 = vsub.f32 %v771_v42, %v785_v58 }
 0x2f6   :  { %v770_v11 = vadd.f32 %v767_v45, %v753_v8  ;;  %v801_v63 = vsel %vm799_vm4, %v787_v12, 0.0 }
 0x2f8   :  { %v786_v14 = vsub.f32 %v770_v11, %v783_v4 }
 0x2fa   :  { %v800_v17 = vsel %vm799_vm4, %v786_v14, 0.0 }
 0x2fb   :  { %v802_v0 = vadd.f32 %v801_v63, %v800_v17 }
 0x2fd   :  { %803 = vadd.xlane.f32.xlu0 %v802_v0 }
 0x2fe   :  { %1427 = shalt.err (!%p1424_p12)
}
 0x2ff   :  { %s1428_s13 = scalar_lea.hbm %s1814_s3, 256 }
 0x300   :  { %p1429_p13 = scmp.ne.s32.totalorder %s1814_s3, %s1428_s13  ;;  %p1432_p0 = scmp.lt.u32.totalorder %s1428_s13, %s1814_s3 }
 0x302   :  { %p1434_p1 = pnand %p1432_p0, %p1429_p13 }
 0x304   :  { %1437 = shalt.err (!%p1434_p1)
}
 0x305   :  { %826 = dma.vmem_to_hbm [thread:$0]  %s821_s9, 256, %s1814_s3, [#allocation4], %s1467_s25, %s1467_s25, %s1468_s26  }
 0x306   :  { %s1473_s20 = smov [#allocation6]  }
 0x307   :  { %s833_s21 = sshll.u32 %s1473_s20, 4  ;;  %s834_s21 = int_to_ptr.vmem [resolvable:$true] %s833_s21 }
 0x308   :  { %s1438_s23 = scalar_lea.vmem %s834_s21, 128  ;;  %p1443_p3 = scmp.lt.s32.totalorder %s834_s21, %s834_s21 }
 0x309   :  { %p1439_p2 = scmp.ne.s32.totalorder %s834_s21, %s1438_s23  ;;  %p1444_p4 = scmp.lt.s32.totalorder %s1438_s23, %s1438_s23 }
 0x30b   :  { %p1445_p5 = por %p1444_p4, %p1443_p3 }
 0x30d   :  { %p1446_p6 = pnand %p1445_p5, %p1439_p2 }
 0x38a   :  { %v804_v18 = vpop.xlane.xlu0 %803 }
 0x38b   :  { %v805_v19 = vrot.slane %v804_v18, 4 }
 0x38d   :  { %v806_v22 = vadd.f32 %v805_v19, %v804_v18 }
 0x38f   :  { %v807_v59 = vrot.slane %v806_v22, 2 }
 0x391   :  { %v808_v62 = vadd.f32 %v807_v59, %v806_v22 }
 0x393   :  { %v809_v7 = vrot.slane %v808_v62, 1 }
 0x395   :  { %v810_v10 = vadd.f32 %v809_v7, %v808_v62 }
 0x397   :  { %1374 = vpush %v810_v10 }
 0x3c8   :  { %s1375_s22 = spop %1374 }
 0x3c9   :  { %v813_v28 = vstv %s1375_s22 }
 0x3ca   :  { %814 = vst [vmem:[#allocation6] sm:$0xff] %v813_v28 }
 0x3cb   :  { %1449 = shalt.err (!%p1446_p6)
}
 0x3cc   :  { %s1450_s25 = scalar_lea.hbm %s1815_s4, 128 }
 0x3cd   :  { %p1451_p7 = scmp.ne.s32.totalorder %s1815_s4, %s1450_s25  ;;  %p1454_p8 = scmp.lt.u32.totalorder %s1450_s25, %s1815_s4 }
 0x3cf   :  { %p1456_p9 = pnand %p1454_p8, %p1451_p7 }
 0x3d1   :  { %1459 = shalt.err (!%p1456_p9)
}
 0x3d2   :  { %836 = dma.vmem_to_hbm [thread:$0]  %s834_s21, 128, %s1815_s4, [#allocation7]  }
 0x3d3   :  { %1462 = dma.done.wait [#allocation4], 256  }
 0x3d4   :  { %1463 = vsyncadd [#allocation4], 4294967040 }
 0x3d5   :  { %1464 = dma.done.wait [#allocation7], 128  }
 0x3d6   :  { %1465 = vsyncadd [#allocation7], 4294967168 }
 0x3d7   :  { %843 = vsyncpa [#allocation3], 1 }
 0x3d8   :  { %844 = vsyncpa [#allocation4], 1 }
 0x3d9   :  { %845 = vsyncpa [#allocation7], 1 }

</bundles_post_ra>
